<compile_context>
chip_gen: v7x
topology: tpu7x:2x2x1
jax: 0.10.0
libtpu: 0.0.40
codegen_flags: <defaults>
</compile_context>

<pallas_src>
import functools

import jax
import jax.numpy as jnp
from jax.experimental import pallas as pl
from jax.experimental.pallas import tpu as pltpu


def _critic_kernel(o_ref, a_ref, w1o_ref, w1a_ref, b1_ref,
                   w2_ref, b2_ref, w3_ref, b3_ref, q_ref):
    # Layer 1 (concat fused): (tm, Do)@(Do, H1) + (tm, Da)@(Da, H1) + b1, relu
    h1 = jnp.dot(o_ref[...], w1o_ref[...], preferred_element_type=jnp.float32)
    h1 = h1 + jnp.dot(a_ref[...], w1a_ref[...],
                      preferred_element_type=jnp.float32)
    h1 = jnp.maximum(h1 + b1_ref[...], 0.0)

    # Layer 2: (tm, H1)@(H1, H2) + b2, relu  (MXU)
    h2 = jnp.dot(h1, w2_ref[...], preferred_element_type=jnp.float32)
    h2 = jnp.maximum(h2 + b2_ref[...], 0.0)

    # Layer 3, lane-dense: (1, H2) @ (H2, tm) -> (1, tm) row so the output
    # store is a full-width unmasked vst and the HBM writeback is dense.
    q_row = jnp.dot(w3_ref[...], h2.T, preferred_element_type=jnp.float32)
    q_ref[...] = (q_row + b3_ref[0]).astype(q_ref.dtype)


@functools.partial(jax.jit, static_argnames=("tile_m",))
def critic_forward(o, a, params, tile_m=512):
    """Pallas implementation of Critic.forward(o, a).

    tile_m: upper bound on the batch tile. Default 512 amortizes per-step
            overhead on v5e/v6e; for B > 128 the tile is chosen so the batch
            grid has >= 2 steps (v7x has 2 TensorCores per chip).
    """
    w1_o, w1_a, b1, w2, b2, w3, b3 = params
    B, obs_dim = o.shape
    act_dim = a.shape[1]
    H1 = w1_o.shape[1]
    H2 = w2.shape[1]

    tile_m = max(128, (tile_m // 128) * 128)

    if B <= 128:
        tm = ((B + 7) // 8) * 8               # single, sublane-aligned tile
    else:
        # ceil(B/2) rounded up to 128 => at least 2 grid steps, tm % 128 == 0
        half = ((((B + 1) // 2) + 127) // 128) * 128
        tm = min(tile_m, half)
    n_tiles = pl.cdiv(B, tm)
    grid = (n_tiles,)

    # Weights/biases: whole array resident in VMEM, same block every step
    # (fetched once; batch tiles stream past them).
    def w_spec(arr):
        return pl.BlockSpec(arr.shape, lambda i: (0,) * arr.ndim)

    flops = 2 * n_tiles * tm * ((obs_dim + act_dim) * H1 + H1 * H2 + H2)
    bytes_accessed = 4 * (n_tiles * tm * (obs_dim + act_dim + 1)
                          + (obs_dim + act_dim) * H1 + H1
                          + H1 * H2 + H2 + H2 + 1)

    q_row = pl.pallas_call(
        _critic_kernel,
        out_shape=jax.ShapeDtypeStruct((1, n_tiles * tm), jnp.float32),
        grid=grid,
        in_specs=[
            pl.BlockSpec((tm, obs_dim), lambda i: (i, 0)),   # o batch tile
            pl.BlockSpec((tm, act_dim), lambda i: (i, 0)),   # a batch tile
            w_spec(w1_o), w_spec(w1_a), w_spec(b1),
            w_spec(w2), w_spec(b2), w_spec(w3),
            pl.BlockSpec(memory_space=pltpu.SMEM),           # b3 scalar
        ],
        out_specs=pl.BlockSpec((1, tm), lambda i: (0, i)),   # lane-dense row
        compiler_params=pltpu.CompilerParams(
            dimension_semantics=("parallel",),
            vmem_limit_bytes=16 << 20),
        cost_estimate=pl.CostEstimate(flops=flops, transcendentals=0,
                                      bytes_accessed=bytes_accessed),
    )(o, a, w1_o, w1_a, b1, w2, b2, w3, b3)

    # Tiny (B,)-element slice/reshape; no full-input pad/copy anywhere.
    return q_row[0, :B, None]


def init_critic_params(key, obs_dim, act_dim, hidden_1=128, hidden_2=128):
    """Deterministic init mimicking torch.nn.Linear U(-1/sqrt(fan_in), +).

    W1 is stored pre-split into (obs_dim, H1) and (act_dim, H1) so the kernel
    fuses the o/a concat. W3 is stored as a (1, H2) row; b3 as a (1,) scalar.
    """
    def uniform(k, shape, fan_in):
        bound = 1.0 / jnp.sqrt(jnp.float32(fan_in))
        return jax.random.uniform(k, shape, jnp.float32, -bound, bound)

    obs_act_dim = obs_dim + act_dim
    k1o, k1a, kb1, k2, kb2, k3, kb3 = jax.random.split(key, 7)
    w1_o = uniform(k1o, (obs_dim, hidden_1), obs_act_dim)
    w1_a = uniform(k1a, (act_dim, hidden_1), obs_act_dim)
    b1 = uniform(kb1, (1, hidden_1), obs_act_dim)
    w2 = uniform(k2, (hidden_1, hidden_2), hidden_1)
    b2 = uniform(kb2, (1, hidden_2), hidden_1)
    w3 = uniform(k3, (1, hidden_2), hidden_2)          # row vector
    b3 = uniform(kb3, (1,), hidden_2)                  # scalar (SMEM)
    return (w1_o, w1_a, b1, w2, b2, w3, b3)


def critic_reference(o, a, params):
    w1_o, w1_a, b1, w2, b2, w3, b3 = params
    h1 = jnp.maximum(o @ w1_o + a @ w1_a + b1, 0.0)
    h2 = jnp.maximum(h1 @ w2 + b2, 0.0)
    return h2 @ w3.T + b3


if __name__ == "__main__":
    # dim_info = [obs_dim, act_dim]
    obs_dim, act_dim = 12, 4
    batch = 8
    hidden_1, hidden_2 = 128, 128

    key = jax.random.PRNGKey(0)
    ko, ka, kp = jax.random.split(key, 3)
    o = jax.random.normal(ko, (batch, obs_dim), jnp.float32)
    a = jax.random.normal(ka, (batch, act_dim), jnp.float32)
    params = init_critic_params(kp, obs_dim, act_dim, hidden_1, hidden_2)

    q = critic_forward(o, a, params)
    q = jax.block_until_ready(q)

    q_ref = critic_reference(o, a, params)
    assert q.shape == (batch, 1), q.shape
    assert jnp.allclose(q, q_ref, atol=1e-4, rtol=1e-4), (q, q_ref)

    # Also exercise the multi-step grid with an uneven boundary block
    # (B = 600 -> tm = 384, grid = 2, last tile partially out of range).
    big_b = 600
    kbo, kba = jax.random.split(jax.random.PRNGKey(1))
    ob = jax.random.normal(kbo, (big_b, obs_dim), jnp.float32)
    ab = jax.random.normal(kba, (big_b, act_dim), jnp.float32)
    qb = jax.block_until_ready(critic_forward(ob, ab, params))
    qb_ref = critic_reference(ob, ab, params)
    assert qb.shape == (big_b, 1), qb.shape
    assert jnp.allclose(qb, qb_ref, atol=1e-4, rtol=1e-4)

    print("KERNEL_OK")
</pallas_src>

<mosaic_0001>
module attributes {stable_mosaic.version = 11 : i64} {
  func.func @_critic_kernel(%arg0: i32, %arg1: memref<8x12xf32, #tpu.memory_space<vmem>>, %arg2: memref<8x4xf32, #tpu.memory_space<vmem>>, %arg3: memref<12x128xf32, #tpu.memory_space<vmem>>, %arg4: memref<4x128xf32, #tpu.memory_space<vmem>>, %arg5: memref<1x128xf32, #tpu.memory_space<vmem>>, %arg6: memref<128x128xf32, #tpu.memory_space<vmem>>, %arg7: memref<1x128xf32, #tpu.memory_space<vmem>>, %arg8: memref<1x128xf32, #tpu.memory_space<vmem>>, %arg9: memref<1xf32, #tpu.memory_space<smem>>, %arg10: memref<1x8xf32, #tpu.memory_space<vmem>>) attributes {dimension_semantics = [#tpu.dimension_semantics<parallel>], iteration_bounds = array<i64: 1>, scalar_prefetch = 0 : i64, scratch_operands = 0 : i64, tpu.core_type = #tpu.core_type<tc>, window_params = [{transform_indices = @transform_0, window_bounds = array<i64: 8, 12>}, {transform_indices = @transform_1, window_bounds = array<i64: 8, 4>}, {pipeline_mode = #tpu.pipeline_mode<synchronous>, transform_indices = @transform_2, window_bounds = array<i64: 12, 128>}, {pipeline_mode = #tpu.pipeline_mode<synchronous>, transform_indices = @transform_3, window_bounds = array<i64: 4, 128>}, {pipeline_mode = #tpu.pipeline_mode<synchronous>, transform_indices = @transform_4, window_bounds = array<i64: 1, 128>}, {pipeline_mode = #tpu.pipeline_mode<synchronous>, transform_indices = @transform_5, window_bounds = array<i64: 128, 128>}, {pipeline_mode = #tpu.pipeline_mode<synchronous>, transform_indices = @transform_6, window_bounds = array<i64: 1, 128>}, {pipeline_mode = #tpu.pipeline_mode<synchronous>, transform_indices = @transform_7, window_bounds = array<i64: 1, 128>}, {transform_indices = @transform_8, window_bounds = array<i64: 1>}, {transform_indices = @transform_9, window_bounds = array<i64: 1, 8>}]} {
    %c0 = arith.constant 0 : index
    %c0_0 = arith.constant 0 : index
    %0 = vector.load %arg1[%c0, %c0_0] : memref<8x12xf32, #tpu.memory_space<vmem>>, vector<8x12xf32>
    %c0_1 = arith.constant 0 : index
    %c0_2 = arith.constant 0 : index
    %1 = vector.load %arg3[%c0_1, %c0_2] : memref<12x128xf32, #tpu.memory_space<vmem>>, vector<12x128xf32>
    %cst = arith.constant dense<0.000000e+00> : vector<8x128xf32>
    %2 = tpu.matmul %0, %1, %cst {dimension_numbers = #tpu.dot_dimension_numbers<[1], [0], [0], [1], [0, 0, 1, 1], [], []>} : vector<8x12xf32>, vector<12x128xf32>, vector<8x128xf32> -> vector<8x128xf32>
    %c0_3 = arith.constant 0 : index
    %c0_4 = arith.constant 0 : index
    %3 = vector.load %arg2[%c0_3, %c0_4] : memref<8x4xf32, #tpu.memory_space<vmem>>, vector<8x4xf32>
    %c0_5 = arith.constant 0 : index
    %c0_6 = arith.constant 0 : index
    %4 = vector.load %arg4[%c0_5, %c0_6] : memref<4x128xf32, #tpu.memory_space<vmem>>, vector<4x128xf32>
    %cst_7 = arith.constant dense<0.000000e+00> : vector<8x128xf32>
    %5 = tpu.matmul %3, %4, %cst_7 {dimension_numbers = #tpu.dot_dimension_numbers<[1], [0], [0], [1], [0, 0, 1, 1], [], []>} : vector<8x4xf32>, vector<4x128xf32>, vector<8x128xf32> -> vector<8x128xf32>
    %6 = arith.addf %2, %5 : vector<8x128xf32>
    %c0_8 = arith.constant 0 : index
    %c0_9 = arith.constant 0 : index
    %7 = vector.load %arg5[%c0_8, %c0_9] : memref<1x128xf32, #tpu.memory_space<vmem>>, vector<1x128xf32>
    %8 = vector.broadcast %7 : vector<1x128xf32> to vector<8x128xf32>
    %9 = arith.addf %6, %8 : vector<8x128xf32>
    %cst_10 = arith.constant 0.000000e+00 : f32
    %10 = vector.broadcast %cst_10 : f32 to vector<8x128xf32>
    %11 = arith.maximumf %9, %10 : vector<8x128xf32>
    %c0_11 = arith.constant 0 : index
    %c0_12 = arith.constant 0 : index
    %12 = vector.load %arg6[%c0_11, %c0_12] : memref<128x128xf32, #tpu.memory_space<vmem>>, vector<128x128xf32>
    %cst_13 = arith.constant dense<0.000000e+00> : vector<8x128xf32>
    %13 = tpu.matmul %11, %12, %cst_13 {dimension_numbers = #tpu.dot_dimension_numbers<[1], [0], [0], [1], [0, 0, 1, 1], [], []>} : vector<8x128xf32>, vector<128x128xf32>, vector<8x128xf32> -> vector<8x128xf32>
    %c0_14 = arith.constant 0 : index
    %c0_15 = arith.constant 0 : index
    %14 = vector.load %arg7[%c0_14, %c0_15] : memref<1x128xf32, #tpu.memory_space<vmem>>, vector<1x128xf32>
    %15 = vector.broadcast %14 : vector<1x128xf32> to vector<8x128xf32>
    %16 = arith.addf %13, %15 : vector<8x128xf32>
    %cst_16 = arith.constant 0.000000e+00 : f32
    %17 = vector.broadcast %cst_16 : f32 to vector<8x128xf32>
    %18 = arith.maximumf %16, %17 : vector<8x128xf32>
    %c0_17 = arith.constant 0 : index
    %c0_18 = arith.constant 0 : index
    %19 = vector.load %arg8[%c0_17, %c0_18] : memref<1x128xf32, #tpu.memory_space<vmem>>, vector<1x128xf32>
    %20 = tpu.transpose %18, [1, 0] : vector<8x128xf32> -> vector<128x8xf32>
    %cst_19 = arith.constant dense<0.000000e+00> : vector<1x8xf32>
    %21 = tpu.matmul %19, %20, %cst_19 {dimension_numbers = #tpu.dot_dimension_numbers<[1], [0], [0], [1], [0, 0, 1, 1], [], []>} : vector<1x128xf32>, vector<128x8xf32>, vector<1x8xf32> -> vector<1x8xf32>
    %c0_20 = arith.constant 0 : index
    %22 = memref.load %arg9[%c0_20] : memref<1xf32, #tpu.memory_space<smem>>
    %23 = vector.broadcast %22 : f32 to vector<1x8xf32>
    %24 = arith.addf %21, %23 : vector<1x8xf32>
    %c0_21 = arith.constant 0 : index
    %c0_22 = arith.constant 0 : index
    %25 = vector.load %arg10[%c0_21, %c0_22] : memref<1x8xf32, #tpu.memory_space<vmem>>, vector<1x8xf32>
    tpu.vector_store %arg10[%c0_21, %c0_22], %24 {strides = array<i32>} : memref<1x8xf32, #tpu.memory_space<vmem>>, vector<1x8xf32>,
    return
  }
  func.func @transform_0(%arg0: i32) -> (i32, i32) {
    %c0_i32 = arith.constant 0 : i32
    %c0_i32_0 = arith.constant 0 : i32
    return %arg0, %c0_i32 : i32, i32
  }
  func.func @transform_1(%arg0: i32) -> (i32, i32) {
    %c0_i32 = arith.constant 0 : i32
    %c0_i32_0 = arith.constant 0 : i32
    return %arg0, %c0_i32 : i32, i32
  }
  func.func @transform_2(%arg0: i32) -> (i32, i32) {
    %c0_i32 = arith.constant 0 : i32
    %c0_i32_0 = arith.constant 0 : i32
    %c0_i32_1 = arith.constant 0 : i32
    return %c0_i32, %c0_i32_0 : i32, i32
  }
  func.func @transform_3(%arg0: i32) -> (i32, i32) {
    %c0_i32 = arith.constant 0 : i32
    %c0_i32_0 = arith.constant 0 : i32
    %c0_i32_1 = arith.constant 0 : i32
    return %c0_i32, %c0_i32_0 : i32, i32
  }
  func.func @transform_4(%arg0: i32) -> (i32, i32) {
    %c0_i32 = arith.constant 0 : i32
    %c0_i32_0 = arith.constant 0 : i32
    %c0_i32_1 = arith.constant 0 : i32
    return %c0_i32, %c0_i32_0 : i32, i32
  }
  func.func @transform_5(%arg0: i32) -> (i32, i32) {
    %c0_i32 = arith.constant 0 : i32
    %c0_i32_0 = arith.constant 0 : i32
    %c0_i32_1 = arith.constant 0 : i32
    return %c0_i32, %c0_i32_0 : i32, i32
  }
  func.func @transform_6(%arg0: i32) -> (i32, i32) {
    %c0_i32 = arith.constant 0 : i32
    %c0_i32_0 = arith.constant 0 : i32
    %c0_i32_1 = arith.constant 0 : i32
    return %c0_i32, %c0_i32_0 : i32, i32
  }
  func.func @transform_7(%arg0: i32) -> (i32, i32) {
    %c0_i32 = arith.constant 0 : i32
    %c0_i32_0 = arith.constant 0 : i32
    %c0_i32_1 = arith.constant 0 : i32
    return %c0_i32, %c0_i32_0 : i32, i32
  }
  func.func @transform_8(%arg0: i32) -> i32 {
    %c0_i32 = arith.constant 0 : i32
    %c0_i32_0 = arith.constant 0 : i32
    return %c0_i32 : i32
  }
  func.func @transform_9(%arg0: i32) -> (i32, i32) {
    %c0_i32 = arith.constant 0 : i32
    %c0_i32_0 = arith.constant 0 : i32
    return %c0_i32, %arg0 : i32, i32
  }
}

</mosaic_0001>

<bundles_post_ra>
// kernel: critic_forward.1
= control target key start
LH: loop header
LB: loop body
LE: loop exit
PB: predicated region body
PF: predicated region fallthrough
CT: control target
= control target key end

     0   :  { %15 = vsyncpa [#allocation4], 0  ;;  %s735_s0 = inlined_call_operand.hbm [shape: f32[8,12], index: 0, kind: input, shape index: {}]   ;;  %s736_s1 = inlined_call_operand.vmem [shape: f32[8,4], index: 1, kind: input, shape index: {}]   ;;  %s737_s2 = inlined_call_operand.vmem [shape: f32[12,128], index: 2, kind: input, shape index: {}]   ;;  %s738_s3 = inlined_call_operand.vmem [shape: f32[4,128], index: 3, kind: input, shape index: {}]   ;;  %s739_s4 = inlined_call_operand.vmem [shape: f32[1,128], index: 4, kind: input, shape index: {}]   ;;  %s740_s5 = inlined_call_operand.hbm [shape: f32[128,128], index: 5, kind: input, shape index: {}]   ;;  %s741_s6 = inlined_call_operand.vmem [shape: f32[1,128], index: 6, kind: input, shape index: {}]   ;;  %s742_s7 = inlined_call_operand.vmem [shape: f32[1,128], index: 7, kind: input, shape index: {}]   ;;  %s743_s8 = inlined_call_operand.<no memory space> [shape: f32[1], index: 8, kind: input, shape index: {}]   ;;  %s744_s9 = inlined_call_operand.hbm [shape: f32[1,8], index: 9, kind: output, shape index: {}]  }
   0x1   :  { %16 = vsyncpa [#allocation7], 0 }
   0x2   :  { %17 = vsyncpa [#allocation5], 0  ;;  %s605_s30 = smov [#allocation3]   ;;  %s606_s11 = smov [#allocation6]  }
   0x3   :  { %s24_s10 = sshll.u32 %s605_s30, 4  ;;  %s41_s12 = sshll.u32 %s606_s11, 4  ;;  %s25_s10 = int_to_ptr.vmem [resolvable:$true] %s24_s10  ;;  %s664_s12 = int_to_ptr.vmem [resolvable:$true] %s41_s12 }
   0x4   :  { %s533_s15 = scalar_lea.hbm %s735_s0, 128 }
   0x5   :  { %p534_p0 = scmp.ne.s32.totalorder %s735_s0, %s533_s15  ;;  %p537_p1 = scmp.lt.u32.totalorder %s533_s15, %s735_s0 }
   0x7   :  { %p539_p2 = pnand %p537_p1, %p534_p0 }
   0x9   :  { %542 = shalt.err (!%p539_p2)
}
   0xa   :  { %s543_s20 = scalar_lea.vmem %s25_s10, 128  ;;  %p548_p4 = scmp.lt.s32.totalorder %s25_s10, %s25_s10 }
   0xb   :  { %p544_p3 = scmp.ne.s32.totalorder %s25_s10, %s543_s20  ;;  %p549_p5 = scmp.lt.s32.totalorder %s543_s20, %s543_s20 }
   0xd   :  { %p550_p6 = por %p549_p5, %p548_p4 }
   0xf   :  { %p551_p7 = pnand %p550_p6, %p544_p3 }
  0x11   :  { %554 = shalt.err (!%p551_p7)
}
  0x12   :  { %27 = dma.hbm_to_vmem [thread:$0]  %s735_s0, 128, %s25_s10, [#allocation4]  }
  0x13   :  { %s555_s25 = scalar_lea.hbm %s740_s5, 2048 }
  0x14   :  { %p556_p8 = scmp.ne.s32.totalorder %s740_s5, %s555_s25  ;;  %p559_p9 = scmp.lt.u32.totalorder %s555_s25, %s740_s5 }
  0x16   :  { %p561_p10 = pnand %p559_p9, %p556_p8 }
  0x18   :  { %564 = shalt.err (!%p561_p10)
}
  0x19   :  { %s565_s30 = scalar_lea.vmem %s664_s12, 2048  ;;  %p570_p12 = scmp.lt.s32.totalorder %s664_s12, %s664_s12 }
  0x1a   :  { %p566_p11 = scmp.ne.s32.totalorder %s664_s12, %s565_s30  ;;  %p571_p13 = scmp.lt.s32.totalorder %s565_s30, %s565_s30 }
  0x1c   :  { %p572_p0 = por %p571_p13, %p570_p12 }
  0x1e   :  { %p573_p1 = pnand %p572_p0, %p566_p11 }
  0x20   :  { %576 = shalt.err (!%p573_p1)
}
  0x21   :  { %s607_s0 = smov 128   ;;  %s608_s10 = smov 8  }
  0x22   :  { %47 = dma.hbm_to_vmem [thread:$0]  %s740_s5, 2048, %s664_s12, [#allocation7], %s607_s0, %s607_s0, %s608_s10  }
  0x23   :  { %599 = dma.done.wait [#allocation4], 128  }
  0x24   :  { %600 = vsyncadd [#allocation4], 4294967168 }
  0x25   :  { %601 = dma.done.wait [#allocation7], 2048  }
  0x26   :  { %602 = vsyncadd [#allocation7], 4294965248  ;;  %v609_v0 = vmov 0.0   ;;  %vm610_vm0 = vmmov 0   ;;  %v611_v1 = vmov 0.0|0.0   ;;  %vm69_vm1 = vcmask 1043456  }
  0x27   :  { %444 = vmatprep.subr.mxu1 %v609_v0  ;;  %446 = vmatprep.mubr.msk.f32.mxu1 %vm610_vm0, %v609_v0  ;;  %vm65_vm2 = vcmask 31744   ;;  %v64_v2 = vld [vmem:[%s738_s3] sm:$0xf]  ;;  %vm612_vm3 = vmmov 1   ;;  %v62_v5 = vld [vmem:[%s737_s2 + $0x8] sm:$0xf]  ;;  %v325_v46 = vstv %s743_s8 }
  0x28   :  { %500 = vmatprep.subr.bf16.mxu0 %v611_v1  ;;  %488 = vmatprep.mubr.msk.f32.mxu0 %vm610_vm0, %v609_v0  ;;  %v63_v3 = vld [vmem:[%s736_s1] sm:$0xff]  ;;  %vm498_vm4 = vmpackc.low %vm69_vm1, %vm612_vm3  ;;  %v229_v6 = vld [vmem:[#allocation6] sm:$0xff]  ;;  %vm143_vm5 = vcmask 97280   ;;  %s613_s24 = smov [#allocation8]   ;;  %vm396_vm6 = vcmask 57344  }
  0x29   :  { %v61_v4 = vld [vmem:[%s737_s2] sm:$0xff]  ;;  %445 = vmatpush3.msk.msra.mxu1 %vm69_vm1, %v64_v2  ;;  %v230_v8 = vld [vmem:[#allocation6 + $0x8] sm:$0xff]  ;;  %v231_v9 = vld [vmem:[#allocation6 + $0x10] sm:$0xff]  ;;  %s404_s25 = sshll.u32 %s613_s24, 4  ;;  %s405_s25 = int_to_ptr.vmem [resolvable:$true] %s404_s25 }
  0x2a   :  { %447 = vmatmul.mubr.msk.f32.vlgmr.msra.gmra.mrb[0].mxu1 %vm65_vm2, %v63_v3  ;;  %496 = vmatprep.subr.bf16.mxu1 %v611_v1  ;;  %v497_v7 = vpack.c.bf16 %v62_v5, %v61_v4  ;;  %v232_v10 = vld [vmem:[#allocation6 + $0x18] sm:$0xff]  ;;  %v501_v11 = vpack.c.bf16 %v230_v8, %v229_v6  ;;  %v233_v14 = vld [vmem:[#allocation6 + $0x20] sm:$0xff]  ;;  %v234_v15 = vld [vmem:[#allocation6 + $0x28] sm:$0xff]  ;;  %s581_s26 = scalar_lea.vmem %s405_s25, 32  ;;  %p582_p3 = scmp.lt.s32.totalorder %s405_s25, %s405_s25 }
  0x2b   :  { %453 = vmatprep.mubr.msk.f32.mxu1 %vm610_vm0, %v609_v0  ;;  %v60_v12 = vld [vmem:[#allocation3] sm:$0xff]  ;;  %v504_v13 = vpack.c.bf16 %v232_v10, %v231_v9  ;;  %v507_v16 = vpack.c.bf16 %v234_v15, %v233_v14  ;;  %v235_v17 = vld [vmem:[#allocation6 + $0x30] sm:$0xff]  ;;  %v237_v20 = vld [vmem:[#allocation6 + $0x40] sm:$0xff] }
  0x2c   :  { %499 = vmatpush3.bf16.msk.msra.mxu1 %vm498_vm4, %v497_v7  ;;  %502 = vmatpush3.bf16.msra.mxu0 %v501_v11  ;;  %v236_v18 = vld [vmem:[#allocation6 + $0x38] sm:$0xff]  ;;  %v238_v21 = vld [vmem:[#allocation6 + $0x48] sm:$0xff]  ;;  %v239_v23 = vld [vmem:[#allocation6 + $0x50] sm:$0xff] }
  0x2d   :  { %491 = vmatprep.subr.mxu1 %v609_v0  ;;  %503 = vmatprep.subr.bf16.mxu0 %v611_v1  ;;  %v510_v19 = vpack.c.bf16 %v236_v18, %v235_v17  ;;  %v513_v22 = vpack.c.bf16 %v238_v21, %v237_v20  ;;  %v240_v24 = vld [vmem:[#allocation6 + $0x58] sm:$0xff]  ;;  %v241_v26 = vld [vmem:[#allocation6 + $0x60] sm:$0xff]  ;;  %v242_v27 = vld [vmem:[#allocation6 + $0x68] sm:$0xff] }
  0x2e   :  { %v516_v25 = vpack.c.bf16 %v240_v24, %v239_v23  ;;  %v519_v28 = vpack.c.bf16 %v242_v27, %v241_v26  ;;  %v243_v29 = vld [vmem:[#allocation6 + $0x70] sm:$0xff]  ;;  %v244_v30 = vld [vmem:[#allocation6 + $0x78] sm:$0xff] }
  0x2f   :  { %454 = vmatmul.mubr.msk.f32.vlgmr.msra.gmra.mrb[2].mxu1 %vm143_vm5, %v60_v12  ;;  %v522_v31 = vpack.c.bf16 %v244_v30, %v243_v29  ;;  %v418_v35 = vld [vmem:[%s739_s4] ss:$0 sm:$0xff] }
  0x30   :  { %493 = vmatprep.mubr.msk.f32.mxu1 %vm610_vm0, %v609_v0  ;;  %505 = vmatpush3.bf16.msra.mxu0 %v504_v13  ;;  %v419_v40 = vld [vmem:[%s741_s6] ss:$0 sm:$0xff]  ;;  %s577_s6 = scalar_lea.vmem %s405_s25, 16 }
  0x31   :  { %506 = vmatprep.subr.bf16.mxu0 %v611_v1  ;;  %v323_v45 = vld [vmem:[%s742_s7] sm:$0x1]  ;;  %p578_p2 = scmp.ne.s32.totalorder %s405_s25, %s577_s6  ;;  %p583_p4 = scmp.lt.s32.totalorder %s581_s26, %s577_s6 }
  0x33   :  { %p584_p5 = por %p583_p4, %p582_p3 }
  0x34   :  { %508 = vmatpush3.bf16.msra.mxu0 %v507_v16 }
  0x35   :  { %509 = vmatprep.subr.bf16.mxu0 %v611_v1  ;;  %p585_p6 = pnand %p584_p5, %p578_p2 }
  0x38   :  { %511 = vmatpush3.bf16.msra.mxu0 %v510_v19 }
  0x39   :  { %512 = vmatprep.subr.bf16.mxu0 %v611_v1 }
  0x3c   :  { %514 = vmatpush3.bf16.msra.mxu0 %v513_v22 }
  0x3d   :  { %515 = vmatprep.subr.bf16.mxu0 %v611_v1 }
  0x40   :  { %517 = vmatpush3.bf16.msra.mxu0 %v516_v25 }
  0x41   :  { %518 = vmatprep.subr.bf16.mxu0 %v611_v1 }
  0x44   :  { %520 = vmatpush3.bf16.msra.mxu0 %v519_v28 }
  0x45   :  { %521 = vmatprep.subr.bf16.mxu0 %v611_v1 }
  0x48   :  { %523 = vmatpush3.bf16.msra.mxu0 %v522_v31 }
  0xfd   :  { %v139_v32 = vpop.f32.mrb[0].mxu1 }
  0xfe   :  { %v448_v33 = vpop.f32.mrb[1].mxu1 }
 0x102   :  { %v216_v34 = vpop.f32.mrb[2].mxu1 }
 0x103   :  { %v217_v36 = vadd.f32 %v216_v34, %v139_v32  ;;  %v455_v37 = vpop.f32.mrb[3].mxu1 }
 0x105   :  { %v227_v38 = vadd.f32 %v418_v35, %v217_v36 }
 0x107   :  { %v228_v39 = vmax.f32 %v227_v38, 0.0 }
 0x109   :  { %489 = vmatmul.mubr.f32.vlgmr.msra.gmra.mrb[0].mxu0 %v228_v39 }
 0x1dc   :  { %v318_v41 = vpop.f32.mrb[0].mxu0 }
 0x1dd   :  { %v319_v42 = vadd.f32 %v419_v40, %v318_v41  ;;  %v490_v43 = vpop.f32.mrb[1].mxu0 }
 0x1df   :  { %v322_v44 = vmax.f32 %v319_v42, 0.0 }
 0x1e1   :  { %492 = vmatpush3.xpose.msra.mxu1 %v322_v44 }
 0x1e4   :  { %494 = vmatmul.mubr.f32.vlgmr.msra.gmra.mrb[4].mxu1 %v323_v45 }
 0x2b7   :  { %v392_v47 = vpop.f32.mrb[4].mxu1 }
 0x2b8   :  { %v393_v48 = vadd.f32 %v392_v47, %v325_v46  ;;  %v495_v49 = vpop.f32.mrb[5].mxu1 }
 0x2ba   :  { %397 = vst.msk [vmem:[#allocation8] sm:$0x1] %vm396_vm6, %v393_v48 }
 0x2bb   :  { %588 = shalt.err (!%p585_p6)
}
 0x2bc   :  { %s589_s8 = scalar_lea.hbm %s744_s9, 16 }
 0x2bd   :  { %p590_p7 = scmp.ne.s32.totalorder %s744_s9, %s589_s8  ;;  %p593_p8 = scmp.lt.u32.totalorder %s589_s8, %s744_s9 }
 0x2bf   :  { %p595_p9 = pnand %p593_p8, %p590_p7 }
 0x2c1   :  { %598 = shalt.err (!%p595_p9)
}
 0x2c2   :  { %407 = dma.vmem_to_hbm [thread:$0]  %s405_s25, 16, %s744_s9, [#allocation5]  }
 0x2c3   :  { %603 = dma.done.wait [#allocation5], 16  }
 0x2c4   :  { %604 = vsyncadd [#allocation5], 4294967280 }
 0x2c5   :  { %411 = vsyncpa [#allocation4], 1 }
 0x2c6   :  { %412 = vsyncpa [#allocation7], 1 }
 0x2c7   :  { %413 = vsyncpa [#allocation5], 1 }

</bundles_post_ra>
